<compile_context>
chip_gen: v5e
topology: v5e:2x2
jax: 0.10.0
libtpu: 0.0.40
codegen_flags: <defaults>
</compile_context>

<pallas_src>
import jax
import jax.numpy as jnp
from jax.experimental import pallas as pl
from jax.experimental.pallas import tpu as pltpu

LANES = 128     # lane width of one vreg row / of the output row
SUBLANES = 8    # sublane count of one f32 vreg
HID = 5         # hidden width of test_net
OUT = 2         # output width of test_net


def _pad_to_lanes(n: int) -> int:
    return ((n + LANES - 1) // LANES) * LANES


def init_params(key, num_layers: int, input_size: int):
    """Deterministic synthetic parameters matching test_net.__init__ shapes.

    torch nn.Linear stores weight as [out, in]; we store the transposed
    [in, out] so every layer is a row-vector @ W matmul.
    """
    ks = jax.random.split(key, 2 * (num_layers + 2))
    i = iter(range(len(ks)))

    def lin(in_f, out_f):
        w = jax.random.normal(ks[next(i)], (in_f, out_f), jnp.float32) * 0.1
        b = jax.random.normal(ks[next(i)], (1, out_f), jnp.float32) * 0.1
        return w, b

    w1, b1 = lin(input_size, HID)
    wm_list, bm_list = [], []
    for _ in range(num_layers):
        w, b = lin(HID, HID)
        wm_list.append(w)
        bm_list.append(b)
    wm = jnp.stack(wm_list, axis=0)   # [L, 5, 5]
    bm = jnp.stack(bm_list, axis=0)   # [L, 1, 5]
    wo, bo = lin(HID, OUT)
    return w1, b1, wm, bm, wo, bo


def pack_params(w1, b1, wm, bm, wo, bo):
    """Fold the whole network and pack W_aug^T lane-dense into [8, D_pad] f32.

    Valid ONLY because test_net has no activation between Linear layers:
        (((x W1 + b1) W2 + b2) ... Wo + bo) == x (W1 W2 ... Wo) + (folded bias)
    Layout of the returned buffer `packed` ([8, D_pad], D_pad = align128(D+1)):
        packed[j, k]   = W_total[k, j]   for j < 2, k < D     (weights)
        packed[j, D]   = b_total[j]      for j < 2            (bias, via x_aug 1)
        everything else is zero (rows 2..7, lanes D+1..D_pad-1).
    """
    num_layers = wm.shape[0]
    m = w1.astype(jnp.float32)                 # [D, 5]
    c = b1.astype(jnp.float32)                 # [1, 5]
    for l in range(num_layers):                # static, tiny, runs once at pack
        m = m @ wm[l]
        c = c @ wm[l] + bm[l]
    w_total = m @ wo                           # [D, 2]
    b_total = c @ wo + bo                      # [1, 2]
    w_aug = jnp.concatenate([w_total, b_total], axis=0)   # [D+1, 2]

    d_aug = w_aug.shape[0]
    d_pad = _pad_to_lanes(d_aug)
    packed = jnp.zeros((SUBLANES, d_pad), jnp.float32)
    packed = packed.at[:OUT, :d_aug].set(w_aug.T)          # lane-dense rows
    return packed                              # [8, D_pad] f32


def _kernel(x_ref, w_ref, o_ref):
    # x_ref: [1, D_pad]   w_ref: [8, D_pad]   o_ref: [1, 128]
    x = x_ref[...]                                      # [1, D_pad]
    w = w_ref[...]                                      # [8, D_pad]
    prod = w * x                                        # VPU, bcast over sublanes
    col = jnp.sum(prod, axis=1, keepdims=True)          # [8, 1]  XLU lane-reduce
    # Place col[j] into lane j of a lane-dense [1, 128] row (unmasked store).
    row_ids = jax.lax.broadcasted_iota(jnp.int32, (SUBLANES, LANES), 0)
    lane_ids = jax.lax.broadcasted_iota(jnp.int32, (SUBLANES, LANES), 1)
    diag = (row_ids == lane_ids).astype(jnp.float32)    # [8, 128]
    out_row = jnp.sum(col * diag, axis=0, keepdims=True)  # [1, 128] sublane-reduce
    o_ref[...] = out_row.astype(o_ref.dtype)


@jax.jit
def test_net_forward(x, packed_params):
    # Flatten exactly like torch's x.view(-1), append the bias-1, pad to lanes.
    x_flat = jnp.reshape(x, (1, -1)).astype(jnp.float32)
    d = x_flat.shape[1]
    d_pad = packed_params.shape[1]
    x_aug = jnp.concatenate([x_flat, jnp.ones((1, 1), jnp.float32)], axis=1)
    x_aug = jnp.pad(x_aug, ((0, 0), (0, d_pad - (d + 1))))   # [1, D_pad]

    vmem = pl.BlockSpec(memory_space=pltpu.MemorySpace.VMEM)
    # Honest hint: one multiply+reduce pass over the 8 x D_pad slab + the
    # diagonal select; bytes are the real (lane-dense) operand sizes.
    flops = 2 * SUBLANES * d_pad + 2 * SUBLANES * LANES
    bytes_accessed = 4 * (d_pad + SUBLANES * d_pad + LANES)

    out = pl.pallas_call(
        _kernel,
        out_shape=jax.ShapeDtypeStruct((1, LANES), jnp.float32),
        in_specs=[vmem, vmem],
        out_specs=vmem,
        cost_estimate=pl.CostEstimate(
            flops=flops, transcendentals=0, bytes_accessed=bytes_accessed
        ),
    )(x_aug, packed_params)
    # TODO(synk): for very large input_size add a 1-D K-grid over D_pad with a
    # VMEM accumulator instead of the single resident slab (VMEM ceiling on v7x).
    # torch output of nn.Linear on a 1-D input is 1-D: shape (2,)
    return out[0, :OUT]


def reference_forward(x, w1, b1, wm, bm, wo, bo):
    """Unfused per-layer forward (mirrors the torch module) for validation."""
    h = jnp.reshape(x, (1, -1)).astype(jnp.float32)
    h = h @ w1 + b1
    for l in range(wm.shape[0]):
        h = h @ wm[l] + bm[l]
    return (h @ wo + bo)[0]


if __name__ == "__main__":
    NUM_LAYERS = 3
    X_SHAPE = (4, 8)                  # module flattens -> input_size = 32
    INPUT_SIZE = 4 * 8

    key = jax.random.PRNGKey(0)
    k_x, k_p = jax.random.split(key)
    x = jax.random.normal(k_x, X_SHAPE, jnp.float32)
    params = init_params(k_p, NUM_LAYERS, INPUT_SIZE)

    packed = pack_params(*params)     # done once per weight set (not per call)

    y = test_net_forward(x, packed)
    y = jax.block_until_ready(y)

    y_ref = reference_forward(x, *params)
    assert y.shape == (OUT,), y.shape
    # Full-network fold changes FP associativity vs the per-layer reference.
    assert jnp.allclose(y, y_ref, atol=1e-4, rtol=1e-4), (y, y_ref)

    print("KERNEL_OK")
</pallas_src>

<mosaic_0001>
module attributes {stable_mosaic.version = 11 : i64} {
  func.func @_kernel(%arg0: memref<1x128xf32, #tpu.memory_space<vmem>>, %arg1: memref<8x128xf32, #tpu.memory_space<vmem>>, %arg2: memref<1x128xf32, #tpu.memory_space<vmem>>) attributes {dimension_semantics = [], scalar_prefetch = 0 : i64, scratch_operands = 0 : i64, tpu.core_type = #tpu.core_type<tc>} {
    %c0 = arith.constant 0 : index
    %c0_0 = arith.constant 0 : index
    %0 = vector.load %arg0[%c0, %c0_0] : memref<1x128xf32, #tpu.memory_space<vmem>>, vector<1x128xf32>
    %c0_1 = arith.constant 0 : index
    %c0_2 = arith.constant 0 : index
    %1 = vector.load %arg1[%c0_1, %c0_2] : memref<8x128xf32, #tpu.memory_space<vmem>>, vector<8x128xf32>
    %2 = vector.broadcast %0 : vector<1x128xf32> to vector<8x128xf32>
    %3 = arith.mulf %1, %2 : vector<8x128xf32>
    %cst = arith.constant dense<0.000000e+00> : vector<8xf32>
    %4 = vector.multi_reduction <add>, %3, %cst [1] : vector<8x128xf32> to vector<8xf32>
    %5 = vector.shape_cast %4 : vector<8xf32> to vector<8x1xf32>
    %6 = tpu.iota {dimensions = array<i32: 0>} : vector<8x128xi32>
    %7 = tpu.iota {dimensions = array<i32: 1>} : vector<8x128xi32>
    %8 = arith.cmpi eq, %6, %7 : vector<8x128xi32>
    %9 = arith.extui %8 : vector<8x128xi1> to vector<8x128xi32>
    %10 = arith.sitofp %9 : vector<8x128xi32> to vector<8x128xf32>
    %11 = vector.broadcast %5 : vector<8x1xf32> to vector<8x128xf32>
    %12 = arith.mulf %11, %10 : vector<8x128xf32>
    %cst_3 = arith.constant dense<0.000000e+00> : vector<128xf32>
    %13 = vector.multi_reduction <add>, %12, %cst_3 [0] : vector<8x128xf32> to vector<128xf32>
    %14 = vector.shape_cast %13 : vector<128xf32> to vector<1x128xf32>
    %c0_4 = arith.constant 0 : index
    %c0_5 = arith.constant 0 : index
    %15 = vector.load %arg2[%c0_4, %c0_5] : memref<1x128xf32, #tpu.memory_space<vmem>>, vector<1x128xf32>
    tpu.vector_store %arg2[%c0_4, %c0_5], %14 {strides = array<i32>} : memref<1x128xf32, #tpu.memory_space<vmem>>, vector<1x128xf32>,
    return
  }
}

</mosaic_0001>

<bundles_post_ra>
// kernel: test_net_forward.1
= control target key start
LH: loop header
LB: loop body
LE: loop exit
PB: predicated region body
PF: predicated region fallthrough
CT: control target
= control target key end

     0   :  { %v19_v3 = vlaneseq  ;;  %v41_v6 = vmov 0.0   ;;  %s66_s0 = inlined_call_operand.vmem [shape: f32[1,128], index: 0, kind: input, shape index: {}]   ;;  %s67_s1 = inlined_call_operand.vmem [shape: f32[8,128], index: 1, kind: input, shape index: {}]   ;;  %s68_s2 = inlined_call_operand.vmem [shape: f32[1,128], index: 2, kind: output, shape index: {}]  }
   0x1   :  { %v12_v0 = vld [vmem:[%s67_s1] sm:$0xff] }
   0x2   :  { %v40_v1 = vld [vmem:[%s66_s0] ss:$0 sm:$0xff]  ;;  %v20_v4 = vshrl.u32 %v19_v3, 7  ;;  %v22_v5 = vand.u32 127, %v19_v3 }
   0x3   :  { %v16_v2 = vmul.f32 %v40_v1, %v12_v0 }
   0x4   :  { %vm23_vm0 = vcmp.eq.s32.totalorder %v20_v4, %v22_v5 }
   0x5   :  { %17 = vadd.xlane.f32.xlu0 %v16_v2  ;;  %v38_v7 = vsel %vm23_vm0, 1.0, %v41_v6 }
  0x78   :  { %v18_v8 = vpop.xlane.xlu0 %17 }
  0x79   :  { %v26_v9 = vmul.f32 %v38_v7, %v18_v8 }
  0x7b   :  { %v27_v10 = vrot.slane %v26_v9, 4 }
  0x7d   :  { %v28_v11 = vadd.f32 %v27_v10, %v26_v9 }
  0x7f   :  { %v29_v12 = vrot.slane %v28_v11, 2 }
  0x81   :  { %v30_v13 = vadd.f32 %v29_v12, %v28_v11 }
  0x83   :  { %v31_v14 = vrot.slane %v30_v13, 1 }
  0x85   :  { %v32_v15 = vadd.f32 %v31_v14, %v30_v13 }
  0x87   :  { %33 = vst [vmem:[%s68_s2] sm:$0x1] %v32_v15 }

</bundles_post_ra>
